<compile_context>
chip_gen: v7x
topology: tpu7x:2x2x1
jax: 0.10.0
libtpu: 0.0.40
codegen_flags: <defaults>
</compile_context>

<pallas_src>
import functools

import jax
import jax.numpy as jnp
from jax.experimental import pallas as pl
from jax.experimental.pallas import tpu as pltpu


def _round_up(a, b):
    return (a + b - 1) // b * b


# ----------------------------- Pallas kernel --------------------------------

def _moe_kernel(sched_ref, valid_ref, y_ref, w_ref, gu_ref, dw_ref,
                o_ref, acc_ref, *, tI):
    """Grid = (token_tile t [parallel], expert_slot j, intermediate_tile i).

    sched_ref: (nT, E) SMEM   expert id to process for slot j of tile t
    valid_ref: (nT, E) SMEM   1 if slot j of tile t is a real (used) expert
    y_ref    : (tm, Hp)       bf16 token activations for this tile
    w_ref    : (1, tm, 1)     f32 routing weight column of expert sched[t, j]
    gu_ref   : (1, Hp, 2*tI)  bf16 fused [gate | up] I-slab of expert sched[t, j]
    dw_ref   : (1, tI, Hp)    bf16 down-weight I-slab
    o_ref    : (tm, Hp)       output block (written on last (j, i) step)
    acc_ref  : (tm, Hp)       f32 accumulator scratch
    """
    t = pl.program_id(0)
    j = pl.program_id(1)
    i = pl.program_id(2)
    nj = pl.num_programs(1)
    ni = pl.num_programs(2)

    @pl.when(jnp.logical_and(j == 0, i == 0))
    def _():
        acc_ref[...] = jnp.zeros_like(acc_ref)

    @pl.when(valid_ref[t, j] != 0)
    def _():
        x = y_ref[...]                                                  # bf16
        gu = jnp.dot(x, gu_ref[0], preferred_element_type=jnp.float32)  # (tm, 2tI)
        g = gu[:, :tI]                                                  # lane-aligned slice
        u = gu[:, tI:]
        # SwiGLU; routing weight applied on the small (tm, tI) intermediate
        # (exact — the down projection is linear in `a`), which is ~H/tI less
        # VALU work than scaling the (tm, Hp) partial sum every step.
        a = (g * jax.nn.sigmoid(g)) * u * w_ref[0]
        d = jnp.dot(a.astype(jnp.bfloat16), dw_ref[0],
                    preferred_element_type=jnp.float32)                 # (tm, Hp)
        acc_ref[...] += d

    @pl.when(jnp.logical_and(j == nj - 1, i == ni - 1))
    def _():
        o_ref[...] = acc_ref[...].astype(o_ref.dtype)


# --------------------------- Tile-size selection ------------------------------

def _pick_tiles(T, Hp, I, out_bytes, vmem_budget):
    """Pick (tm, tI): largest token tile first (raises weight-stream arithmetic
    intensity), then the largest intermediate tile that fits the VMEM budget."""
    Ip_base = _round_up(I, 128)

    def footprint(tm, tI):
        y_b = 2 * tm * Hp * 2                    # bf16 activations, double-buffered
        gu_b = 2 * Hp * (2 * tI) * 2             # fused gate+up slab, double-buffered
        dw_b = 2 * tI * Hp * 2                   # down slab, double-buffered
        w_b = 2 * tm * 128 * 4                   # routing column (lane-padded)
        out_b = 2 * tm * Hp * out_bytes          # output block, double-buffered
        acc_b = tm * Hp * 4                      # f32 accumulator scratch
        return y_b + gu_b + dw_b + w_b + out_b + acc_b

    if T >= 1024:
        tm_cands = [512, 256, 128, 64]
    elif T >= 16:
        # Keep >= 2 token tiles so v7x's second TensorCore gets work on the
        # "parallel" axis even for small batches.
        tm_half = _round_up(-(-T // 2), 8)
        first = min(256, tm_half)
        tm_cands = [first] + [c for c in (128, 64, 32) if c < first]
    else:
        tm_cands = [_round_up(max(T, 1), 8)]

    tI_cands = [c for c in (1024, 512, 256, 128) if c <= Ip_base]

    # Prefer tI >= 256 (fewer accumulator RMW passes / grid steps); fall back
    # to 128 only if nothing larger fits.
    for tm in tm_cands:
        for tI in [c for c in tI_cands if c >= 256]:
            if footprint(tm, tI) <= vmem_budget:
                return tm, tI, footprint(tm, tI)
    for tm in tm_cands:
        for tI in tI_cands:
            if footprint(tm, tI) <= vmem_budget:
                return tm, tI, footprint(tm, tI)
    tm, tI = tm_cands[-1], tI_cands[-1]
    return tm, tI, footprint(tm, tI)


# ------------------------------ JAX wrapper ----------------------------------

def block_sparse_mlp(x, router_w, gate_w, up_w, down_w, num_experts_per_tok,
                     activate_all_experts=False):
    """x: (..., H). router_w: (H, E), gate_w/up_w: (E, H, I), down_w: (E, I, H)."""
    hidden = x.shape[-1]
    orig_shape = x.shape
    y = x.reshape(-1, hidden)
    T = y.shape[0]
    E = router_w.shape[1]
    I = gate_w.shape[2]

    # ---- routing gate (tiny matmul -> plain XLA; its <128-lane output would
    #      only produce masked stores in a Pallas kernel) ----
    logits = jnp.dot(y.astype(jnp.float32), router_w.astype(jnp.float32))
    probs = jax.nn.softmax(logits, axis=-1)
    k = E if activate_all_experts else num_experts_per_tok
    topk_w, sel = jax.lax.top_k(probs, k)
    topk_w = topk_w / jnp.sum(topk_w, axis=-1, keepdims=True)
    one_hot = jax.nn.one_hot(sel, E, dtype=jnp.float32)            # (T, k, E)
    w_dense = jnp.einsum("tke,tk->te", one_hot, topk_w)            # (T, E)

    # ---- VMEM budget + tile sizes (per-generation) ----
    out_bytes = jnp.dtype(x.dtype).itemsize
    Hp = _round_up(hidden, 128)                 # lane-dense H for y/out/down blocks
    try:
        vmem_cap = int(pltpu.get_tpu_info().vmem_capacity_bytes)
    except Exception:
        vmem_cap = 64 << 20                     # conservative default (v7x-sized)
    budget = int(vmem_cap * 0.65)               # leave headroom for Mosaic scratch
    tm, tI, fp_bytes = _pick_tiles(T, Hp, I, out_bytes, budget)
    Tp = _round_up(T, tm)
    nT = Tp // tm
    Ip = _round_up(I, tI)
    nI = Ip // tI

    # ---- pad + cast operands (bf16 MXU operands; accumulation stays f32) ----
    y16 = y.astype(jnp.bfloat16)
    if Tp != T or Hp != hidden:
        y16 = jnp.pad(y16, ((0, Tp - T), (0, Hp - hidden)))
    w_dense_p = jnp.pad(w_dense, ((0, Tp - T), (0, 0))) if Tp != T else w_dense

    gate16 = gate_w.astype(jnp.bfloat16)
    up16 = up_w.astype(jnp.bfloat16)
    down16 = down_w.astype(jnp.bfloat16)
    if Hp != hidden or Ip != I:
        gate16 = jnp.pad(gate16, ((0, 0), (0, Hp - hidden), (0, Ip - I)))
        up16 = jnp.pad(up16, ((0, 0), (0, Hp - hidden), (0, Ip - I)))
        down16 = jnp.pad(down16, ((0, 0), (0, Ip - I), (0, Hp - hidden)))

    # Fuse gate+up per I-tile: last-axis block i of gu16 holds
    # [gate[:, :, i*tI:(i+1)*tI] | up[:, :, i*tI:(i+1)*tI]]  -> one DMA stream,
    # one MXU dot per step, g/u split at a lane-aligned tI boundary.
    gu16 = jnp.concatenate(
        [gate16.reshape(E, Hp, nI, tI), up16.reshape(E, Hp, nI, tI)],
        axis=-1).reshape(E, Hp, 2 * Ip)

    # Per-expert routing column, (E, Tp, 1) f32 (indexed by actual expert id).
    w_e = w_dense_p.T.reshape(E, Tp, 1)

    # ---- per-token-tile expert schedule (active experts first; padded slots
    #      repeat the last active expert so their weight DMA dedups and their
    #      compute is skipped with pl.when) ----
    used = (w_dense_p.reshape(nT, tm, E) > 0).any(axis=1)          # (nT, E)
    used_i = used.astype(jnp.int32)
    order = jnp.argsort(-used_i, axis=1)                           # active ids first
    n_act = used_i.sum(axis=1)                                     # (nT,)
    pos = jnp.arange(E)[None, :]
    valid = (pos < n_act[:, None]).astype(jnp.int32)               # (nT, E)
    last = order[jnp.arange(nT), jnp.maximum(n_act - 1, 0)]        # (nT,)
    sched = jnp.where(valid == 1, order, last[:, None]).astype(jnp.int32)

    # ---- index maps (scalar-prefetch refs arrive as trailing args) ----
    def y_map(t, j, i, sched_ref, valid_ref):
        return (t, 0)

    def w_map(t, j, i, sched_ref, valid_ref):
        return (sched_ref[t, j], t, 0)

    def gu_map(t, j, i, sched_ref, valid_ref):
        v = valid_ref[t, j]
        # Padded slots pin the I-tile index to the previous step's -> DMA skipped.
        return (sched_ref[t, j], 0, i * v + (nI - 1) * (1 - v))

    def d_map(t, j, i, sched_ref, valid_ref):
        v = valid_ref[t, j]
        return (sched_ref[t, j], i * v + (nI - 1) * (1 - v), 0)

    def o_map(t, j, i, sched_ref, valid_ref):
        return (t, 0)

    # ---- cost estimate (advisory, lets XLA schedule around the call) ----
    flops = int(6 * max(T, 1) * k * Hp * Ip)
    bytes_accessed = int(nT * E * 3 * Hp * Ip * 2      # weight stream, re-fetched per token tile
                         + Tp * Hp * (2 + out_bytes)   # activations in + out
                         + Tp * E * 4)                 # routing columns
    cost = pl.CostEstimate(flops=flops,
                           transcendentals=int(max(T, 1) * k * Ip),
                           bytes_accessed=bytes_accessed)

    vmem_limit = int(min(vmem_cap, fp_bytes + (16 << 20)))

    out = pl.pallas_call(
        functools.partial(_moe_kernel, tI=tI),
        out_shape=jax.ShapeDtypeStruct((Tp, Hp), x.dtype),
        grid_spec=pltpu.PrefetchScalarGridSpec(
            num_scalar_prefetch=2,
            grid=(nT, E, nI),
            in_specs=[
                pl.BlockSpec((tm, Hp), y_map),           # y (resident per t)
                pl.BlockSpec((1, tm, 1), w_map),         # routing column
                pl.BlockSpec((1, Hp, 2 * tI), gu_map),   # fused gate|up slab
                pl.BlockSpec((1, tI, Hp), d_map),        # down slab
            ],
            out_specs=pl.BlockSpec((tm, Hp), o_map),
            scratch_shapes=[pltpu.VMEM((tm, Hp), jnp.float32)],
        ),
        compiler_params=pltpu.CompilerParams(
            dimension_semantics=("parallel", "arbitrary", "arbitrary"),
            vmem_limit_bytes=vmem_limit),
        cost_estimate=cost,
    )(sched, valid, y16, w_e, gu16, down16)

    out = out[:T, :hidden]
    return out.reshape(orig_shape)


# ------------------------------ Reference ------------------------------------

def _reference(x, router_w, gate_w, up_w, down_w, k):
    """Pure-JAX reference mimicking the kernel's bf16 operand precision
    (routing weight applied to the intermediate before the bf16 cast)."""
    hidden = x.shape[-1]
    y = x.reshape(-1, hidden)
    yf = y.astype(jnp.float32)
    logits = yf @ router_w.astype(jnp.float32)
    probs = jax.nn.softmax(logits, axis=-1)
    topk_w, sel = jax.lax.top_k(probs, k)
    topk_w = topk_w / jnp.sum(topk_w, axis=-1, keepdims=True)
    E = router_w.shape[1]
    w_dense = jnp.einsum("tke,tk->te",
                         jax.nn.one_hot(sel, E, dtype=jnp.float32), topk_w)
    yb = y.astype(jnp.bfloat16).astype(jnp.float32)
    out = jnp.zeros_like(yf)
    for e in range(E):
        g = yb @ gate_w[e].astype(jnp.float32)
        u = yb @ up_w[e].astype(jnp.float32)
        a = (g * jax.nn.sigmoid(g)) * u * w_dense[:, e:e + 1]
        a = a.astype(jnp.bfloat16).astype(jnp.float32)
        out = out + a @ down_w[e].astype(jnp.float32)
    return out.reshape(x.shape).astype(x.dtype)


# --------------------------------- Main ---------------------------------------

if __name__ == "__main__":
    batch, seq = 2, 8
    hidden_size = 128
    intermediate_size = 256
    num_experts = 4
    num_experts_per_tok = 2

    key = jax.random.PRNGKey(0)
    k_x, k_r, k_g, k_u, k_d = jax.random.split(key, 5)

    x = jax.random.normal(k_x, (batch, seq, hidden_size), dtype=jnp.float32)
    router_w = jax.random.normal(k_r, (hidden_size, num_experts),
                                 dtype=jnp.float32) * 0.05
    gate_w = (jax.random.normal(
        k_g, (num_experts, hidden_size, intermediate_size),
        dtype=jnp.float32) * 0.05).astype(jnp.bfloat16)
    up_w = (jax.random.normal(
        k_u, (num_experts, hidden_size, intermediate_size),
        dtype=jnp.float32) * 0.05).astype(jnp.bfloat16)
    down_w = (jax.random.normal(
        k_d, (num_experts, intermediate_size, hidden_size),
        dtype=jnp.float32) * 0.05).astype(jnp.bfloat16)

    out = block_sparse_mlp(x, router_w, gate_w, up_w, down_w,
                           num_experts_per_tok)
    out = jax.block_until_ready(out)

    ref = _reference(x, router_w, gate_w, up_w, down_w, num_experts_per_tok)
    assert out.shape == x.shape and out.dtype == x.dtype
    assert jnp.allclose(out, ref, atol=5e-3, rtol=5e-3), "mismatch vs reference"

    print("KERNEL_OK")
</pallas_src>

<mosaic_0001>
module attributes {stable_mosaic.version = 11 : i64} {
  func.func @_moe_kernel(%arg0: i32, %arg1: i32, %arg2: i32, %arg3: memref<2x4xi32, #tpu.memory_space<smem>>, %arg4: memref<2x4xi32, #tpu.memory_space<smem>>, %arg5: memref<8x128xbf16, #tpu.memory_space<vmem>>, %arg6: memref<1x8x1xf32, #tpu.memory_space<vmem>>, %arg7: memref<1x128x512xbf16, #tpu.memory_space<vmem>>, %arg8: memref<1x256x128xbf16, #tpu.memory_space<vmem>>, %arg9: memref<8x128xf32, #tpu.memory_space<vmem>>, %arg10: memref<8x128xf32, #tpu.memory_space<vmem>>) attributes {dimension_semantics = [#tpu.dimension_semantics<parallel>, #tpu.dimension_semantics<arbitrary>, #tpu.dimension_semantics<arbitrary>], iteration_bounds = array<i64: 2, 4, 1>, scalar_prefetch = 2 : i64, scratch_operands = 1 : i64, tpu.core_type = #tpu.core_type<tc>, window_params = [{transform_indices = @transform_0, window_bounds = array<i64: 8, 128>}, {transform_indices = @transform_1, window_bounds = array<i64: 1, 8, 1>}, {transform_indices = @transform_2, window_bounds = array<i64: 1, 128, 512>}, {transform_indices = @transform_3, window_bounds = array<i64: 1, 256, 128>}, {transform_indices = @transform_4, window_bounds = array<i64: 8, 128>}]} {
    %c0_i32 = arith.constant 0 : i32
    %0 = arith.cmpi eq, %arg1, %c0_i32 : i32
    %c0_i32_0 = arith.constant 0 : i32
    %1 = arith.cmpi eq, %arg2, %c0_i32_0 : i32
    %2 = arith.andi %0, %1 : i1
    %3 = arith.extui %2 : i1 to i32
    %c0_i32_1 = arith.constant 0 : i32
    %4 = arith.cmpi ne, %3, %c0_i32_1 : i32
    scf.if %4 {
      %cst = arith.constant 0.000000e+00 : f32
      %16 = vector.broadcast %cst : f32 to vector<8x128xf32>
      %c0 = arith.constant 0 : index
      %c0_6 = arith.constant 0 : index
      %17 = vector.load %arg10[%c0, %c0_6] : memref<8x128xf32, #tpu.memory_space<vmem>>, vector<8x128xf32>
      tpu.vector_store %arg10[%c0, %c0_6], %16 {strides = array<i32>} : memref<8x128xf32, #tpu.memory_space<vmem>>, vector<8x128xf32>,
    } else {
    }
    %5 = arith.index_cast %arg0 : i32 to index
    %6 = arith.index_cast %arg1 : i32 to index
    %7 = memref.load %arg4[%5, %6] : memref<2x4xi32, #tpu.memory_space<smem>>
    %c0_i32_2 = arith.constant 0 : i32
    %8 = arith.cmpi ne, %7, %c0_i32_2 : i32
    %9 = arith.extui %8 : i1 to i32
    %c0_i32_3 = arith.constant 0 : i32
    %10 = arith.cmpi ne, %9, %c0_i32_3 : i32
    scf.if %10 {
      %c0 = arith.constant 0 : index
      %c0_6 = arith.constant 0 : index
      %16 = vector.load %arg5[%c0, %c0_6] : memref<8x128xbf16, #tpu.memory_space<vmem>>, vector<8x128xbf16>
      %c0_7 = arith.constant 0 : index
      %c0_8 = arith.constant 0 : index
      %c0_9 = arith.constant 0 : index
      %17 = vector.load %arg7[%c0_7, %c0_8, %c0_9] : memref<1x128x512xbf16, #tpu.memory_space<vmem>>, vector<1x128x512xbf16>
      %18 = vector.shape_cast %17 : vector<1x128x512xbf16> to vector<128x512xbf16>
      %cst = arith.constant dense<0.000000e+00> : vector<8x512xf32>
      %19 = tpu.matmul %16, %18, %cst {dimension_numbers = #tpu.dot_dimension_numbers<[1], [0], [0], [1], [0, 0, 1, 1], [], []>} : vector<8x128xbf16>, vector<128x512xbf16>, vector<8x512xf32> -> vector<8x512xf32>
      %20 = vector.extract_strided_slice %19 {offsets = [0, 0], sizes = [8, 256], strides = [1, 1]} : vector<8x512xf32> to vector<8x256xf32>
      %21 = vector.extract_strided_slice %19 {offsets = [0, 256], sizes = [8, 256], strides = [1, 1]} : vector<8x512xf32> to vector<8x256xf32>
      %22 = arith.negf %20 : vector<8x256xf32>
      %23 = math.exp %22 : vector<8x256xf32>
      %cst_10 = arith.constant 1.000000e+00 : f32
      %24 = vector.broadcast %cst_10 : f32 to vector<8x256xf32>
      %25 = arith.addf %24, %23 : vector<8x256xf32>
      %26 = arith.divf %24, %25 : vector<8x256xf32>
      %27 = arith.mulf %20, %26 : vector<8x256xf32>
      %28 = arith.mulf %27, %21 : vector<8x256xf32>
      %c0_11 = arith.constant 0 : index
      %c0_12 = arith.constant 0 : index
      %c0_13 = arith.constant 0 : index
      %29 = vector.load %arg6[%c0_11, %c0_12, %c0_13] : memref<1x8x1xf32, #tpu.memory_space<vmem>>, vector<1x8x1xf32>
      %30 = vector.shape_cast %29 : vector<1x8x1xf32> to vector<8x1xf32>
      %31 = vector.broadcast %30 : vector<8x1xf32> to vector<8x256xf32>
      %32 = arith.mulf %28, %31 : vector<8x256xf32>
      %33 = arith.truncf %32 : vector<8x256xf32> to vector<8x256xbf16>
      %c0_14 = arith.constant 0 : index
      %c0_15 = arith.constant 0 : index
      %c0_16 = arith.constant 0 : index
      %34 = vector.load %arg8[%c0_14, %c0_15, %c0_16] : memref<1x256x128xbf16, #tpu.memory_space<vmem>>, vector<1x256x128xbf16>
      %35 = vector.shape_cast %34 : vector<1x256x128xbf16> to vector<256x128xbf16>
      %cst_17 = arith.constant dense<0.000000e+00> : vector<8x128xf32>
      %36 = tpu.matmul %33, %35, %cst_17 {dimension_numbers = #tpu.dot_dimension_numbers<[1], [0], [0], [1], [0, 0, 1, 1], [], []>} : vector<8x256xbf16>, vector<256x128xbf16>, vector<8x128xf32> -> vector<8x128xf32>
      %c0_18 = arith.constant 0 : index
      %c0_19 = arith.constant 0 : index
      %37 = vector.load %arg10[%c0_18, %c0_19] : memref<8x128xf32, #tpu.memory_space<vmem>>, vector<8x128xf32>
      %38 = arith.addf %37, %36 : vector<8x128xf32>
      %c0_20 = arith.constant 0 : index
      %c0_21 = arith.constant 0 : index
      %39 = vector.load %arg10[%c0_20, %c0_21] : memref<8x128xf32, #tpu.memory_space<vmem>>, vector<8x128xf32>
      tpu.vector_store %arg10[%c0_20, %c0_21], %38 {strides = array<i32>} : memref<8x128xf32, #tpu.memory_space<vmem>>, vector<8x128xf32>,
    } else {
    }
    %c3_i32 = arith.constant 3 : i32
    %11 = arith.cmpi eq, %arg1, %c3_i32 : i32
    %c0_i32_4 = arith.constant 0 : i32
    %12 = arith.cmpi eq, %arg2, %c0_i32_4 : i32
    %13 = arith.andi %11, %12 : i1
    %14 = arith.extui %13 : i1 to i32
    %c0_i32_5 = arith.constant 0 : i32
    %15 = arith.cmpi ne, %14, %c0_i32_5 : i32
    scf.if %15 {
      %c0 = arith.constant 0 : index
      %c0_6 = arith.constant 0 : index
      %16 = vector.load %arg10[%c0, %c0_6] : memref<8x128xf32, #tpu.memory_space<vmem>>, vector<8x128xf32>
      %c0_7 = arith.constant 0 : index
      %c0_8 = arith.constant 0 : index
      %17 = vector.load %arg9[%c0_7, %c0_8] : memref<8x128xf32, #tpu.memory_space<vmem>>, vector<8x128xf32>
      tpu.vector_store %arg9[%c0_7, %c0_8], %16 {strides = array<i32>} : memref<8x128xf32, #tpu.memory_space<vmem>>, vector<8x128xf32>,
    } else {
    }
    return
  }
  func.func @transform_0(%arg0: i32, %arg1: i32, %arg2: i32, %arg3: memref<2x4xi32, #tpu.memory_space<smem>>, %arg4: memref<2x4xi32, #tpu.memory_space<smem>>) -> (i32, i32) {
    %c0_i32 = arith.constant 0 : i32
    %c0_i32_0 = arith.constant 0 : i32
    return %arg0, %c0_i32 : i32, i32
  }
  func.func @transform_1(%arg0: i32, %arg1: i32, %arg2: i32, %arg3: memref<2x4xi32, #tpu.memory_space<smem>>, %arg4: memref<2x4xi32, #tpu.memory_space<smem>>) -> (i32, i32, i32) {
    %0 = arith.index_cast %arg0 : i32 to index
    %1 = arith.index_cast %arg1 : i32 to index
    %2 = memref.load %arg3[%0, %1] : memref<2x4xi32, #tpu.memory_space<smem>>
    %c0_i32 = arith.constant 0 : i32
    %c0_i32_0 = arith.constant 0 : i32
    return %2, %arg0, %c0_i32 : i32, i32, i32
  }
  func.func @transform_2(%arg0: i32, %arg1: i32, %arg2: i32, %arg3: memref<2x4xi32, #tpu.memory_space<smem>>, %arg4: memref<2x4xi32, #tpu.memory_space<smem>>) -> (i32, i32, i32) {
    %0 = arith.index_cast %arg0 : i32 to index
    %1 = arith.index_cast %arg1 : i32 to index
    %2 = memref.load %arg4[%0, %1] : memref<2x4xi32, #tpu.memory_space<smem>>
    %3 = arith.index_cast %arg0 : i32 to index
    %4 = arith.index_cast %arg1 : i32 to index
    %5 = memref.load %arg3[%3, %4] : memref<2x4xi32, #tpu.memory_space<smem>>
    %6 = arith.muli %arg2, %2 : i32
    %c1_i32 = arith.constant 1 : i32
    %7 = arith.subi %c1_i32, %2 : i32
    %c0_i32 = arith.constant 0 : i32
    %8 = arith.muli %c0_i32, %7 : i32
    %9 = arith.addi %6, %8 : i32
    %c0_i32_0 = arith.constant 0 : i32
    %c0_i32_1 = arith.constant 0 : i32
    return %5, %c0_i32_0, %9 : i32, i32, i32
  }
  func.func @transform_3(%arg0: i32, %arg1: i32, %arg2: i32, %arg3: memref<2x4xi32, #tpu.memory_space<smem>>, %arg4: memref<2x4xi32, #tpu.memory_space<smem>>) -> (i32, i32, i32) {
    %0 = arith.index_cast %arg0 : i32 to index
    %1 = arith.index_cast %arg1 : i32 to index
    %2 = memref.load %arg4[%0, %1] : memref<2x4xi32, #tpu.memory_space<smem>>
    %3 = arith.index_cast %arg0 : i32 to index
    %4 = arith.index_cast %arg1 : i32 to index
    %5 = memref.load %arg3[%3, %4] : memref<2x4xi32, #tpu.memory_space<smem>>
    %6 = arith.muli %arg2, %2 : i32
    %c1_i32 = arith.constant 1 : i32
    %7 = arith.subi %c1_i32, %2 : i32
    %c0_i32 = arith.constant 0 : i32
    %8 = arith.muli %c0_i32, %7 : i32
    %9 = arith.addi %6, %8 : i32
    %c0_i32_0 = arith.constant 0 : i32
    %c0_i32_1 = arith.constant 0 : i32
    return %5, %9, %c0_i32_0 : i32, i32, i32
  }
  func.func @transform_4(%arg0: i32, %arg1: i32, %arg2: i32, %arg3: memref<2x4xi32, #tpu.memory_space<smem>>, %arg4: memref<2x4xi32, #tpu.memory_space<smem>>) -> (i32, i32) {
    %c0_i32 = arith.constant 0 : i32
    %c0_i32_0 = arith.constant 0 : i32
    return %arg0, %c0_i32 : i32, i32
  }
}

</mosaic_0001>

<bundles_post_ra>
// kernel: tpu_custom_call.1
= control target key start
LH: loop header
LB: loop body
LE: loop exit
PB: predicated region body
PF: predicated region fallthrough
CT: control target
= control target key end

     0   :  { %s2198_s0 = inlined_call_operand.vmem [shape: s32[2,4], index: 0, kind: input, shape index: {}]   ;;  %s2199_s2 = inlined_call_operand.vmem [shape: bf16[16,128], index: 2, kind: input, shape index: {}]   ;;  %s2200_s3 = inlined_call_operand.vmem [shape: f32[4,16,1], index: 3, kind: input, shape index: {}]   ;;  %s2201_s4 = inlined_call_operand.hbm [shape: bf16[4,128,512], index: 4, kind: input, shape index: {}]   ;;  %s2202_s5 = inlined_call_operand.hbm [shape: bf16[4,256,128], index: 5, kind: input, shape index: {}]   ;;  %s2203_s6 = inlined_call_operand.hbm [shape: f32[16,128], index: 6, kind: output, shape index: {}]   ;;  %s2204_s1 = inlined_call_operand.vmem [shape: s32[2,4], index: 1, kind: input, shape index: {}]  }
   0x1   :  { %2218 = sst [smem:[#allocation30_spill]] %s2201_s4  ;;  %s11_s23 = sshll.u32 %s2198_s0, 4  ;;  %s12_s23 = int_to_ptr.vmem [resolvable:$true] %s11_s23 }
   0x2   :  { %2219 = sst [smem:[#allocation31_spill]] %s2203_s6  ;;  %s15_s26 = sshll.u32 %s2204_s1, 4  ;;  %s16_s26 = int_to_ptr.vmem [resolvable:$true] %s15_s26 }
   0x3   :  { %s1467_s27 = scalar_lea.vmem %s12_s23, 32  ;;  %p1472_p1 = scmp.lt.s32.totalorder %s12_s23, %s12_s23 }
   0x4   :  { %p1468_p0 = scmp.ne.s32.totalorder %s12_s23, %s1467_s27  ;;  %p1473_p2 = scmp.lt.s32.totalorder %s1467_s27, %s1467_s27 }
   0x6   :  { %p1474_p3 = por %p1473_p2, %p1472_p1 }
   0x8   :  { %p1475_p4 = pnand %p1474_p3, %p1468_p0 }
   0xa   :  { %1478 = shalt.err (!%p1475_p4)  }
   0xb   :  { %s1705_s28 = smov [#allocation4]   ;;  %s1479_s29 = scalar_lea.vmem %s16_s26, 32 }
   0xc   :  { %14 = dma.vmem_to_smem %s12_s23, 32, %s1705_s28, [#allocation3] }
   0xd   :  { %p1480_p5 = scmp.ne.s32.totalorder %s16_s26, %s1479_s29  ;;  %p1484_p6 = scmp.lt.s32.totalorder %s16_s26, %s16_s26 }
   0xe   :  { %p1485_p7 = scmp.lt.s32.totalorder %s1479_s29, %s1479_s29 }
  0x10   :  { %p1486_p8 = por %p1485_p7, %p1484_p6 }
  0x12   :  { %p1487_p9 = pnand %p1486_p8, %p1480_p5 }
  0x14   :  { %1490 = shalt.err (!%p1487_p9)  }
  0x15   :  { %s1706_s0 = smov [#allocation5]  }
  0x16   :  { %18 = dma.vmem_to_smem %s16_s26, 32, %s1706_s0, [#allocation3] }
  0x17   :  { %1635 = dma.done.wait [#allocation3], 64 }
  0x18   :  { %1636 = vsyncadd [#allocation3], 4294967232 }
  0x19   :  { %20 = sfence }
  0x1a   :  { %21 = vsyncpa [#allocation7], 0 }
  0x1b   :  { %23 = vsyncpa [#allocation7 + $0x1], 0 }
  0x1c   :  { %24 = vsyncpa [#allocation10], 0 }
  0x1d   :  { %26 = vsyncpa [#allocation10 + $0x1], 0 }
  0x1e   :  { %27 = vsyncpa [#allocation8], 0 }
  0x1f   :  { %29 = vsyncpa [#allocation8 + $0x1], 0  ;;  %s1757_s1 = smov 0   ;;  %s1759_s30 = smov 0  }
  0x20   :  { %s1761_s7 = smov 0   ;;  %s1763_s8 = smov 0  }
  0x21   :  { %s1765_s9 = smov 0   ;;  %s1767_s10 = smov 0  }
  0x22   :  { %s1769_s11 = smov 0   ;;  %s1771_s12 = smov 0  }
  0x23   :  { %s1773_s13 = smov 0   ;;  %s1775_s14 = smov 0  }
  0x24   :  { %s1777_s15 = smov 0   ;;  %s1779_s16 = smov 0  }
  0x25   :  { %s1781_s17 = smov 0   ;;  %s1783_s18 = smov 0  }
  0x26 LB: > { %2220 = sst [smem:[#allocation20_spill]] %s1651_s1  ;;  %s50_s21 = sadd.s32 1, %s1695_s16  ;;  %s1703_s18 = sphi %s1783_s18, %s35_s18   ;;  %s1699_s17 = sphi %s1781_s17, %s2272_s17   ;;  %s1695_s16 = sphi %s1779_s16, %s2271_s16   ;;  %s1691_s15 = sphi %s1777_s15, %s2261_s15   ;;  %s1687_s14 = sphi %s1775_s14, %s2260_s14   ;;  %s1683_s13 = sphi %s1773_s13, %s2259_s13   ;;  %s1679_s12 = sphi %s1771_s12, %s2270_s12   ;;  %s1675_s11 = sphi %s1769_s11, %s2269_s11   ;;  %s1671_s10 = sphi %s1767_s10, %s2268_s10   ;;  %s1667_s9 = sphi %s1765_s9, %s2267_s9   ;;  %s1663_s8 = sphi %s1763_s8, %s2266_s8   ;;  %s1659_s7 = sphi %s1761_s7, %s2257_s7   ;;  %s1655_s30 = sphi %s1759_s30, %s2265_s30   ;;  %s1651_s1 = sphi %s1757_s1, %s2264_s1  }
  0x27   : > { %2221 = sst [smem:[#allocation21_spill]] %s1659_s7  ;;  %s54_s22 = sadd.s32 1, %s1699_s17 }
  0x28   : > { %2222 = sst [smem:[#allocation22_spill]] %s1683_s13  ;;  %p52_p10 = scmp.ge.s32.totalorder %s50_s21, 4 }
  0x29   : > { %2223 = sst [smem:[#allocation23_spill]] %s1695_s16  ;;  %s128_s23 = sshra.s32 %s1695_s16, 7 }
  0x2a   : > { %2224 = sst [smem:[#allocation24_spill]] %s1699_s17  ;;  %s130_s24 = sadd.s32 %s1699_s17, %s128_s23 }
  0x2b   : > { %s133_s25 = sand.u32 127, %s1695_s16  ;;  %s2274_s21 = smov (%p52_p10, %s50_s21), 0 }
  0x2c   : > { %2225 = sst [smem:[#allocation25_spill]] %s2274_s21  ;;  %s2276_s22 = smov (!%p52_p10, %s54_s22), %s1699_s17 }
  0x2d   : > { %s1141_s26 = sshll.u32 %s130_s24, 7  ;;  %s138_s27 = sshra.s32 %s2274_s21, 7 }
  0x2e   : > { %p56_p11 = scmp.ge.s32.totalorder %s2276_s22, 2  ;;  %s1838_s28 = sadd.s32 %s1141_s26, %s133_s25 }
  0x2f   : > { %s136_s29 = sld [smem:[#allocation4 + %s1838_s28]]  ;;  %s143_s0 = sand.u32 127, %s2274_s21 }
  0x30   : > { %s2278_s22 = smov (%p56_p11, %s2276_s22), 0  ;;  %s153_s23 = sadd.s32 1, %s1683_s13 }
  0x31   : > { %2226 = sst [smem:[#allocation26_spill]] %s2278_s22  ;;  %p160_p12 = scmp.ne.s32.totalorder %s1683_s13, %s1679_s12 }
  0x32   : > { %s140_s24 = sadd.s32 %s138_s27, %s2278_s22  ;;  %p2215_p13 = scmp.eq.s32.totalorder %s1703_s18, 0 }
  0x33   : > { %s1142_s25 = sshll.u32 %s140_s24, 7  ;;  %p166_p0 = scmp.ne.s32.totalorder %s1679_s12, %s1675_s11 }
  0x34   : > { %s1851_s26 = sadd.s32 %s1142_s25, %s143_s0  ;;  %p1855_p1 = por %p2215_p13, %p160_p12 }
  0x35   : > { %s146_s19 = sld [smem:[#allocation4 + %s1851_s26]]  ;;  %s2228_s21 = sadd.s32 4294967295, %s1703_s18  }
  0x36   : > { %p1862_p2 = scmp.eq.s32.totalorder %s2228_s21, 0  ;;  %s1867_s27 = sld [smem:[#allocation4 + %s1838_s28]] }
  0x37   : > { %s224_s11 = ssub.s32 %s1699_s17, %s2278_s22  ;;  %s227_s24 = sadd.s32 1, %s1659_s7 }
  0x38   : > { %p1873_p3 = por %p1862_p2, %p166_p0  ;;  %p225_p4 = scmp.eq.s32.totalorder %s224_s11, 0 }
  0x39   : > { %p237_p5 = scmp.ne.s32.totalorder %s1659_s7, %s1655_s30  ;;  %s2232_s25 = sadd.s32 4294967295, %s1703_s18  }
  0x3a   : > { %s2230_s0 = scalar_select %p1873_p3, 1, 0 }
  0x3b   : > { %s1881_s21 = scalar_select %p225_p4, %s1659_s7, %s227_s24  }
  0x3c   : > { %p238_p6 = scmp.eq.s32.totalorder %s2232_s25, 7  ;;  %p243_p7 = scmp.ne.s32.totalorder %s1655_s30, %s1651_s1 }
  0x3d   : > { %2231 = sst [smem:[#allocation27_spill]] %s1881_s21  ;;  %s148_s22 = ssub.s32 %s136_s29, %s146_s19 }
  0x3e   : > { %s2233_s17 = sadd.s32 4294967294, %s1703_s18   ;;  %p151_p9 = scmp.eq.s32.totalorder %s148_s22, 0 }
  0x3f   : > { %p244_p8 = scmp.eq.s32.totalorder %s2233_s17, 7  ;;  %p1889_p10 = por %p238_p6, %p237_p5 }
  0x40   : > { %s1898_s24 = scalar_select %p151_p9, %s1683_s13, %s153_s23  }
  0x41   : > { %s2234_s6 = scalar_select %p1889_p10, 1, 0 }
  0x42   : > { %p1893_p11 = por %p244_p8, %p243_p7  ;;  %2237 = sst [smem:[#allocation29_spill]] %s1898_s24 }
  0x43   : > { %p2214_p12 = scmp.lt.s32.totalorder %s1703_s18, 8  ;;  %s298_s21 = sand.u32 1, %s1683_s13  }
  0x44   : > { %s2235_s11 = scalar_select %p1893_p11, 1, 0 }
  0x45   : > { %s1147_s25 = sshll.u32 %s298_s21, 8  ;;  %p1906_p0 = pnand %p2214_p12, %p1855_p1 }
  0x46   : > { %2236 = sst [smem:[#allocation28_spill]] %s2235_s11  ;;  %s302_s29 = scalar_lea.vmem [#allocation6], %s1147_s25 }
  0x47   : > { %s1247_s19 = scalar_select %p1855_p1, [#allocation4], [#allocation12] }
  0x48   : > { %s1248_s22 = scalar_select %p1855_p1, %s1838_s28, 0 }
  0x49   : > { %s2280_s19 = smov (!%p2214_p12, %s1247_s19), [#allocation14]  ;;  %s321_s23 = sshll.u32 %s302_s29, 4  ;;  %s1919_s23 = int_to_ptr.vmem [resolvable:$true] %s321_s23 }
  0x4a   : > { %s2282_s22 = smov (!%p2214_p12, %s1248_s22), 0  ;;  %p1155_p4 = scmp.ge.s32.totalorder %s1703_s18, 1 }
  0x4b   : > { %s311_s24 = sld [smem:[%s2280_s19 + %s2282_s22]]  ;;  %p362_p5 = scmp.lt.s32.totalorder %s1703_s18, 9 }
  0x4c   : > { %s2240_s4 = sld [smem:[#allocation30_spill]]  ;;  %s1935_s19 = scalar_lea.sflag [#allocation7], %s298_s21 }
  0x4d   : > { %p1923_p6 = pnand %p1155_p4, %p362_p5  ;;  %s1933_s25 = sld [smem:[#allocation4 + %s1851_s26]] }
  0x4e   : > { %p1493_p7 = pneg %p1906_p0 }
  0x4f   : > { %s2239_s13 = scalar_select %p1923_p6, 1, 0 }
  0x51   : > { %s1221_s7 = sshll.u32 %s311_s24, 12 }
  0x52   : > { %s1930_s1 = scalar_lea.hbm %s2240_s4, %s1221_s7  ;;  %s1496_s7 = scalar_lea.hbm %s2240_s4, 16384 }
  0x53   : > { %s1491_s22 = scalar_lea.hbm %s1930_s1, 4096  ;;  %p1497_p4 = scmp.lt.u32.totalorder %s1930_s1, %s2240_s4 }
  0x54   : > { %p1492_p1 = scmp.ne.s32.totalorder %s1930_s1, %s1491_s22  ;;  %p1498_p5 = scmp.lt.u32.totalorder %s1496_s7, %s1491_s22 }
  0x55   : > { %p1500_p13 = scmp.lt.u32.totalorder %s1491_s22, %s1930_s1 }
  0x56   : > { %p1494_p8 = pnand %p1493_p7, %p1492_p1  ;;  %p1499_p12 = por %p1498_p5, %p1497_p4 }
  0x58   : > { %p1495_p9 = pneg %p1494_p8  ;;  %p1501_p11 = por %p1500_p13, %p1499_p12 }
  0x5a   : > { %p1502_p10 = pnand %p1501_p11, %p1495_p9 }
  0x5c   : > { %1505 = shalt.err (!%p1502_p10)
}
  0x5d   : > { %s1506_s26 = scalar_lea.vmem %s1919_s23, 4096  ;;  %s1707_s21 = smov [#allocation6]  }
  0x5e   : > { %p1507_p1 = scmp.ne.s32.totalorder %s1919_s23, %s1506_s26  ;;  %s1511_s24 = sshll.u32 %s1707_s21, 4  ;;  %s1512_s24 = int_to_ptr.vmem [resolvable:$false] %s1511_s24 }
  0x5f   : > { %s1513_s11 = scalar_lea.vmem %s1512_s24, 8192  ;;  %p1514_p6 = scmp.lt.s32.totalorder %s1919_s23, %s1512_s24 }
  0x60   : > { %p1509_p8 = pnand %p1507_p1, %p1493_p7  ;;  %p1515_p4 = scmp.lt.s32.totalorder %s1513_s11, %s1506_s26 }
  0x62   : > { %p1510_p3 = pneg %p1509_p8  ;;  %p1516_p5 = por %p1515_p4, %p1514_p6 }
  0x64   : > { %p1517_p13 = pnand %p1516_p5, %p1510_p3 }
  0x66   : > { %1520 = shalt.err (!%p1517_p13)
}
  0x67   : > { %s1708_s22 = smov 256   ;;  %s1709_s7 = smov 16  }
  0x68   : > { %1262 = dma.hbm_to_vmem [thread:$0]  (!%p1906_p0), %s1930_s1, 4096, %s1919_s23, %s1935_s19, %s1708_s22, %s1708_s22, %s1709_s7  }
  0x69   : > { %p208_p3 = scmp.ne.s32.totalorder %s1671_s10, %s1667_s9  ;;  %p214_p10 = scmp.ne.s32.totalorder %s1667_s9, %s1663_s8 }
  0x6a   : > { %s331_s29 = sand.u32 1, %s1671_s10   ;;  %p2241_p11 = scmp.eq.s32.totalorder %s1703_s18, 0 }
  0x6b   : > { %p1972_p6 = por %p214_p10, %p1862_p2  ;;  %s1151_s26 = sshll.u32 %s331_s29, 7 }
  0x6c   : > { %p210_p12 = por %p208_p3, %p2241_p11  ;;  %s196_s21 = ssub.s32 %s1867_s27, %s1933_s25 }
  0x6d   : > { %s201_s24 = sadd.s32 1, %s1671_s10  ;;  %p199_p7 = scmp.eq.s32.totalorder %s196_s21, 0 }
  0x6e   : > { %s1250_s11 = scalar_select %p210_p12, [#allocation4], [#allocation13] }
  0x6f   : > { %s1980_s4 = scalar_select %p199_p7, %s1671_s10, %s201_s24  }
  0x70   : > { %s2284_s28 = smov (!%p210_p12, %s1838_s28), 0  ;;  %p2243_p9 = scmp.lt.s32.totalorder %s1703_s18, 8 }
  0x71   : > { %s335_s16 = scalar_lea.vmem [#allocation9], %s1151_s26  ;;  %s2000_s22 = scalar_lea.sflag [#allocation10], %s331_s29 }
  0x72   : > { %s2286_s11 = smov (!%p2243_p9, %s1250_s11), [#allocation15]  ;;  %p2244_p0 = pmov %p2243_p9 }
  0x73   : > { %s354_s27 = sshll.u32 %s335_s16, 4  ;;  %s1526_s21 = scalar_lea.hbm %s2202_s5, 8192  ;;  %s1993_s27 = int_to_ptr.vmem [resolvable:$true] %s354_s27 }
  0x74   : > { %s2288_s28 = smov (!%p2244_p0, %s2284_s28), 0  ;;  %p2245_p1 = pmov %p2244_p0 }
  0x75   : > { %s344_s8 = sld [smem:[%s2286_s11 + %s2288_s28]] }
  0x76   : > { %p1989_p8 = pnand %p2245_p1, %p210_p12 }
  0x78   : > { %p1523_p4 = pneg %p1989_p8 }
  0x7b   : > { %s1222_s17 = sshll.u32 %s344_s8, 11 }
  0x7c   : > { %s1998_s19 = scalar_lea.hbm %s2202_s5, %s1222_s17 }
  0x7d   : > { %s1521_s7 = scalar_lea.hbm %s1998_s19, 2048  ;;  %p1527_p3 = scmp.lt.u32.totalorder %s1998_s19, %s2202_s5 }
  0x7e   : > { %p1522_p2 = scmp.ne.s32.totalorder %s1998_s19, %s1521_s7  ;;  %p1528_p10 = scmp.lt.u32.totalorder %s1526_s21, %s1521_s7 }
  0x7f   : > { %p1530_p12 = scmp.lt.u32.totalorder %s1521_s7, %s1998_s19 }
  0x80   : > { %p1524_p5 = pnand %p1523_p4, %p1522_p2  ;;  %p1529_p11 = por %p1528_p10, %p1527_p3 }
  0x82   : > { %p1525_p13 = pneg %p1524_p5  ;;  %p1531_p7 = por %p1530_p12, %p1529_p11 }
  0x84   : > { %p1532_p9 = pnand %p1531_p7, %p1525_p13 }
  0x86   : > { %1535 = shalt.err (!%p1532_p9)
}
  0x87   : > { %s1536_s29 = scalar_lea.vmem %s1993_s27, 2048  ;;  %s1710_s8 = smov [#allocation9]  }
  0x88   : > { %p1537_p0 = scmp.ne.s32.totalorder %s1993_s27, %s1536_s29  ;;  %s1541_s16 = sshll.u32 %s1710_s8, 4  ;;  %s1542_s16 = int_to_ptr.vmem [resolvable:$false] %s1541_s16 }
  0x89   : > { %s1543_s17 = scalar_lea.vmem %s1542_s16, 4096  ;;  %p1544_p5 = scmp.lt.s32.totalorder %s1993_s27, %s1542_s16 }
  0x8a   : > { %p1539_p1 = pnand %p1537_p0, %p1523_p4  ;;  %p1545_p3 = scmp.lt.s32.totalorder %s1543_s17, %s1536_s29 }
  0x8c   : > { %p1540_p2 = pneg %p1539_p1  ;;  %p1546_p10 = por %p1545_p3, %p1544_p5 }
  0x8e   : > { %p1547_p11 = pnand %p1546_p10, %p1540_p2 }
  0x90   : > { %1550 = shalt.err (!%p1547_p11)
}
  0x91   : > { %s1711_s23 = smov 64   ;;  %s1712_s25 = smov 4  }
  0x92   : > { %1267 = dma.hbm_to_vmem [thread:$0]  (!%p1989_p8), %s1998_s19, 2048, %s1993_s27, %s2000_s22, %s1711_s23, %s1711_s23, %s1712_s25  }
  0x93   : > { %p2247_p4 = scmp.ne.s32.totalorder %s2239_s13, 0 }
  0x94   : > { %s368_s7 = sand.u32 (!%p2247_p4), 1, %s1679_s12   ;;  %p2248_p13 = scmp.ne.s32.totalorder (!%p2247_p4), %s2230_s0, 0 }
  0x95   : > { %366 = sbr.rel (%p2247_p4) target bundleno = 722 (0x2d2), region = 36  ;;  %s1156_s28 = sshll.u32 (!%p2247_p4), %s368_s7, 8 }
  0x96   : > { %s369_s26 = scalar_lea.sflag (!%p2247_p4), [#allocation7], %s368_s7  ;;  %s2031_s21 = scalar_lea.vmem (!%p2247_p4), [#allocation6], %s1156_s28 }
  0x9c   : > { %1638 = dma.done.wait (%p2248_p13), %s369_s26, 4096  }
  0x9d   : > { %1640 = vsyncadd (%p2248_p13), %s369_s26, 4294963200  ;;  %s377_s24 = sand.u32 1, %s1667_s9  }
  0x9e   : > { %s1157_s1 = sshll.u32 %s377_s24, 7  ;;  %s378_s27 = scalar_lea.sflag [#allocation10], %s377_s24 }
  0x9f   : > { %s2038_s19 = scalar_lea.vmem [#allocation9], %s1157_s1 }
  0xa0   : > { %1642 = dma.done.wait (%p1972_p6), %s378_s27, 2048  }
  0xa1   : > { %1644 = vsyncadd (%p1972_p6), %s378_s27, 4294965248  ;;  %p431_p8 = scmp.lt.s32.totalorder %s1691_s15, 1  ;;  %s435_s13 = sshra.s32 %s1687_s14, 7 }
  0xa2   : > { %s437_s0 = sadd.s32 %s1691_s15, %s435_s13  ;;  %s440_s22 = sand.u32 127, %s1687_s14 }
  0xa3   : > { %s432_s11 = scalar_select %p431_p8, %s1691_s15, 1 }
  0xa4   : > { %s1160_s29 = sshll.u32 %s437_s0, 7  ;;  %s428_s8 = sand.u32 1, %s1655_s30  }
  0xa5   : > { %s1159_s16 = sshll.u32 %s432_s11, 2  ;;  %s441_s17 = sadd.s32 %s1160_s29, %s440_s22 }
  0xa6   : > { %s2053_s25 = scalar_lea.vmem %s2199_s2, %s1159_s16  ;;  %s442_s7 = sld [smem:[#allocation4 + %s441_s17]] }
  0xa7   : > { %s2057_s28 = sshll.u32 %s428_s8, 3  ;;  %p482_p6 = scmp.eq.s32.totalorder %s1687_s14, 0 }
  0xa8   : > { %s430_s22 = scalar_lea.vmem [#allocation11], %s2057_s28  ;;  %v1713_v0 = vmov (%p482_p6), 0.0  }
  0xa9   : > { %488 = vst [vmem:[#allocation2] sm:$0xff] (%p482_p6), %v1713_v0 }
  0xac   : > { %p443_p12 = scmp.lt.s32.totalorder %s442_s7, 3  ;;  %487 = sbr.rel (!%p482_p6) target bundleno = 179 (0xb3), region = 48 }
  0xae   : > { %s2290_s7 = smov (!%p443_p12, %s442_s7), 3 }
  0xaf   : > { %s1161_s26 = sshll.u32 %s2290_s7, 1 }
  0xb0   : > { %s448_s24 = sadd.s32 %s1161_s26, %s432_s11 }
  0xb1   : > { %s1162_s1 = sshll.u32 %s448_s24, 3 }
  0xb2   : > { %s2063_s0 = scalar_lea.vmem %s2200_s3, %s1162_s1 }
  0xb3 PF: > { %s496_s29 = sld [smem:[#allocation5 + %s441_s17]] }
  0xb9   : > { %p1165_p7 = scmp.eq.s32.totalorder %s496_s29, 0 }
  0xba   : > { %v1395_v1 = vld [vmem:[%s2031_s21 + $0x4] ss:$16 sps:$4 sm:$0xff] (!%p1165_p7)   ;;  %v1397_v2 = vld [vmem:[%s2031_s21] ss:$16 sps:$4 sm:$0xff] (!%p1165_p7)   ;;  %v1714_v3 = vmov (!%p1165_p7), 0   ;;  %v792_v25 = vld [vmem:[%s2063_s0] sm:$0xff] (!%p1165_p7) }
  0xbb   : > { %500 = sbr.rel (%p1165_p7) target bundleno = 686 (0x2ae), region = 52  ;;  %726 = vmatprep.mubr.bf16.mxu0 (!%p1165_p7), %v1714_v3  ;;  %767 = vmatprep.mubr.bf16.mxu1 (!%p1165_p7), %v1714_v3  ;;  %v1398_v4 = vld [vmem:[%s2031_s21 + $0x24] ss:$16 sps:$4 sm:$0xff] (!%p1165_p7)   ;;  %v1400_v5 = vld [vmem:[%s2031_s21 + $0x20] ss:$16 sps:$4 sm:$0xff] (!%p1165_p7)   ;;  %v1445_v38 = vld [vmem:[%s2038_s19 + $0x48] sm:$0xff] (!%p1165_p7)  }
  0xbc   : > { %694 = vmatprep.subr.bf16.mxu0 (!%p1165_p7), %v1395_v1  ;;  %1394 = vset.pattern.permute.xlu0 (!%p1165_p7), %v1714_v3  ;;  %v1401_v6 = vld [vmem:[%s2031_s21 + $0x44] ss:$16 sps:$4 sm:$0xff] (!%p1165_p7)   ;;  %v1403_v7 = vld [vmem:[%s2031_s21 + $0x40] ss:$16 sps:$4 sm:$0xff] (!%p1165_p7)   ;;  %v1416_v9 = vld [vmem:[%s2031_s21 + $0xc] ss:$16 sps:$4 sm:$0xff] (!%p1165_p7)  }
  0xbd   : > { %695 = vmatpush1.bf16.msra.mxu0 (!%p1165_p7), %v1397_v2  ;;  %v1404_v8 = vld [vmem:[%s2031_s21 + $0x64] ss:$16 sps:$4 sm:$0xff] (!%p1165_p7)   ;;  %v1418_v10 = vld [vmem:[%s2031_s21 + $0x8] ss:$16 sps:$4 sm:$0xff] (!%p1165_p7)   ;;  %v1406_v11 = vld [vmem:[%s2031_s21 + $0x60] ss:$16 sps:$4 sm:$0xff] (!%p1165_p7)   ;;  %735 = vmatprep.subr.bf16.mxu1 (!%p1165_p7), %v1416_v9 }
  0xbe   : > { %696 = vmatprep.subr.bf16.mxu0 (!%p1165_p7), %v1398_v4  ;;  %v1407_v12 = vld [vmem:[%s2031_s21 + $0x84] ss:$16 sps:$4 sm:$0xff] (!%p1165_p7)   ;;  %v1422_v13 = vld [vmem:[%s2031_s21 + $0x2c] ss:$16 sps:$4 sm:$0xff] (!%p1165_p7)   ;;  %736 = vmatpush1.bf16.msra.mxu1 (!%p1165_p7), %v1418_v10  ;;  %v1424_v14 = vld [vmem:[%s2031_s21 + $0x28] ss:$16 sps:$4 sm:$0xff] (!%p1165_p7)  }
  0xbf   : > { %737 = vmatprep.subr.bf16.mxu1 (!%p1165_p7), %v1422_v13  ;;  %v1425_v15 = vld [vmem:[%s2031_s21 + $0x4c] ss:$16 sps:$4 sm:$0xff] (!%p1165_p7)   ;;  %v1409_v16 = vld [vmem:[%s2031_s21 + $0x80] ss:$16 sps:$4 sm:$0xff] (!%p1165_p7)   ;;  %v1410_v17 = vld [vmem:[%s2031_s21 + $0xa4] ss:$16 sps:$4 sm:$0xff] (!%p1165_p7)   ;;  %795 = vperm.xlu0 (!%p1165_p7), %1394, %v792_v25  }
  0xc0   : > { %v1427_v18 = vld [vmem:[%s2031_s21 + $0x48] ss:$16 sps:$4 sm:$0xff] (!%p1165_p7)   ;;  %v1428_v19 = vld [vmem:[%s2031_s21 + $0x6c] ss:$16 sps:$4 sm:$0xff] (!%p1165_p7)   ;;  %v1412_v20 = vld [vmem:[%s2031_s21 + $0xa0] ss:$16 sps:$4 sm:$0xff] (!%p1165_p7)  }
  0xc1   : > { %697 = vmatpush1.bf16.msra.mxu0 (!%p1165_p7), %v1400_v5  ;;  %v1413_v21 = vld [vmem:[%s2031_s21 + $0xc4] ss:$16 sps:$4 sm:$0xff] (!%p1165_p7)   ;;  %v1415_v22 = vld [vmem:[%s2031_s21 + $0xc0] ss:$16 sps:$4 sm:$0xff] (!%p1165_p7)   ;;  %v1430_v23 = vld [vmem:[%s2031_s21 + $0x68] ss:$16 sps:$4 sm:$0xff] (!%p1165_p7)  }
  0xc2   : > { %698 = vmatprep.subr.bf16.mxu0 %v1401_v6  ;;  %738 = vmatpush1.bf16.msra.mxu1 %v1424_v14  ;;  %v1431_v24 = vld [vmem:[%s2031_s21 + $0x8c] ss:$16 sps:$4 sm:$0xff]   ;;  %v1419_v26 = vld [vmem:[%s2031_s21 + $0xe4] ss:$16 sps:$4 sm:$0xff]   ;;  %v1433_v27 = vld [vmem:[%s2031_s21 + $0x88] ss:$16 sps:$4 sm:$0xff]  }
  0xc3   : > { %739 = vmatprep.subr.bf16.mxu1 %v1425_v15  ;;  %v1434_v28 = vld [vmem:[%s2031_s21 + $0xac] ss:$16 sps:$4 sm:$0xff]   ;;  %v1421_v29 = vld [vmem:[%s2031_s21 + $0xe0] ss:$16 sps:$4 sm:$0xff]   ;;  %v1436_v30 = vld [vmem:[%s2031_s21 + $0xa8] ss:$16 sps:$4 sm:$0xff]  }
  0xc4   : > { %v1437_v31 = vld [vmem:[%s2031_s21 + $0xcc] ss:$16 sps:$4 sm:$0xff]   ;;  %v501_v32 = vld [vmem:[%s2053_s25] sm:$0xf]  ;;  %v1443_v36 = vld [vmem:[%s2038_s19 + $0x40] sm:$0xff]  }
  0xc5   : > { %699 = vmatpush1.bf16.msra.mxu0 %v1403_v7  ;;  %v1439_v33 = vld [vmem:[%s2031_s21 + $0xc8] ss:$16 sps:$4 sm:$0xff]   ;;  %v1440_v34 = vld [vmem:[%s2031_s21 + $0xec] ss:$16 sps:$4 sm:$0xff]   ;;  %v1444_v37 = vld [vmem:[%s2038_s19] sm:$0xff]  }
  0xc6   : > { %700 = vmatprep.subr.bf16.mxu0 %v1404_v8  ;;  %740 = vmatpush1.bf16.msra.mxu1 %v1427_v18  ;;  %v1442_v35 = vld [vmem:[%s2031_s21 + $0xe8] ss:$16 sps:$4 sm:$0xff]   ;;  %v1447_v40 = vld [vmem:[%s2038_s19 + $0x50] sm:$0xff]   ;;  %v1451_v44 = vld [vmem:[%s2038_s19 + $0x60] sm:$0xff]  }
  0xc7   : > { %741 = vmatprep.subr.bf16.mxu1 %v1428_v19  ;;  %v1446_v39 = vld [vmem:[%s2038_s19 + $0x8] sm:$0xff]   ;;  %v1448_v41 = vld [vmem:[%s2038_s19 + $0x10] sm:$0xff]   ;;  %v1449_v42 = vld [vmem:[%s2038_s19 + $0x58] sm:$0xff]  }
  0xc8   : > { %v1450_v43 = vld [vmem:[%s2038_s19 + $0x18] sm:$0xff]   ;;  %v1452_v45 = vld [vmem:[%s2038_s19 + $0x20] sm:$0xff]   ;;  %v1453_v46 = vld [vmem:[%s2038_s19 + $0x68] sm:$0xff]  }
  0xc9   : > { %701 = vmatpush1.bf16.msra.mxu0 %v1406_v11  ;;  %v1454_v47 = vld [vmem:[%s2038_s19 + $0x28] sm:$0xff]   ;;  %v1455_v48 = vld [vmem:[%s2038_s19 + $0x70] sm:$0xff]   ;;  %v1457_v50 = vld [vmem:[%s2038_s19 + $0x78] sm:$0xff]  }
  0xca   : > { %702 = vmatprep.subr.bf16.mxu0 %v1407_v12  ;;  %742 = vmatpush1.bf16.msra.mxu1 %v1430_v23  ;;  %v1456_v49 = vld [vmem:[%s2038_s19 + $0x30] sm:$0xff]   ;;  %v1458_v51 = vld [vmem:[%s2038_s19 + $0x38] sm:$0xff]  }
  0xcb   : > { %743 = vmatprep.subr.bf16.mxu1 %v1431_v24  ;;  %v970_v15 = vld [vmem:[#allocation2] sm:$0xff] }
  0xcd   : > { %703 = vmatpush1.bf16.msra.mxu0 %v1409_v16 }
  0xce   : > { %704 = vmatprep.subr.bf16.mxu0 %v1410_v17  ;;  %744 = vmatpush1.bf16.msra.mxu1 %v1433_v27 }
  0xcf   : > { %745 = vmatprep.subr.bf16.mxu1 %v1434_v28 }
  0xd1   : > { %705 = vmatpush1.bf16.msra.mxu0 %v1412_v20 }
  0xd2   : > { %706 = vmatprep.subr.bf16.mxu0 %v1413_v21  ;;  %746 = vmatpush1.bf16.msra.mxu1 %v1436_v30 }
  0xd3   : > { %747 = vmatprep.subr.bf16.mxu1 %v1437_v31 }
  0xd5   : > { %707 = vmatpush1.bf16.msra.mxu0 %v1415_v22 }
  0xd6   : > { %708 = vmatprep.subr.bf16.mxu0 %v1419_v26  ;;  %748 = vmatpush1.bf16.msra.mxu1 %v1439_v33 }
  0xd7   : > { %749 = vmatprep.subr.bf16.mxu1 %v1440_v34 }
  0xd9   : > { %709 = vmatpush1.bf16.msra.mxu0 %v1421_v29 }
  0xda   : > { %750 = vmatpush1.bf16.msra.mxu1 %v1442_v35  ;;  %1225 = vmatprep.subr.bf16.mxu0 %v1443_v36 }
  0xdc   : > { %727 = vmatmul.mubr.bf16.vlgmr.msra.gmra.mrb[0].mxu0 %v501_v32 }
  0xdd   : > { %768 = vmatmul.mubr.bf16.vlgmr.msra.gmra.mrb[0].mxu1 %v501_v32  ;;  %1226 = vmatpush3.bf16.msra.mxu0 %v1444_v37 }
  0xde   : > { %1227 = vmatprep.subr.bf16.mxu0 %v1445_v38 }
  0xe1   : > { %1228 = vmatpush3.bf16.msra.mxu0 %v1446_v39 }
  0xe2   : > { %1229 = vmatprep.subr.bf16.mxu0 %v1447_v40 }
  0xe5   : > { %1230 = vmatpush3.bf16.msra.mxu0 %v1448_v41 }
  0xe6   : > { %1231 = vmatprep.subr.bf16.mxu0 %v1449_v42 }
  0xe9   : > { %1232 = vmatpush3.bf16.msra.mxu0 %v1450_v43 }
  0xea   : > { %1233 = vmatprep.subr.bf16.mxu0 %v1451_v44 }
  0xed   : > { %1234 = vmatpush3.bf16.msra.mxu0 %v1452_v45 }
  0xee   : > { %1235 = vmatprep.subr.bf16.mxu0 %v1453_v46 }
  0xf1   : > { %1236 = vmatpush3.bf16.msra.mxu0 %v1454_v47 }
  0xf2   : > { %1237 = vmatprep.subr.bf16.mxu0 %v1455_v48 }
  0xf5   : > { %1238 = vmatpush3.bf16.msra.mxu0 %v1456_v49 }
  0xf6   : > { %1239 = vmatprep.subr.bf16.mxu0 %v1457_v50 }
  0xf9   : > { %1240 = vmatpush3.bf16.msra.mxu0 %v1458_v51 }
 0x13e   : > { %v796_v6 = vpop.permute.xlu0 %795 }
 0x1af   : > { %v728_v52 = vpop.f32.mrb[0].mxu0 }
 0x1b0   : > { %v1198_v53 = vmul.f32 -1.442695, %v728_v52  ;;  %v730_v54 = vpop.f32.mrb[1].mxu0  ;;  %v769_v58 = vpop.f32.mrb[0].mxu1 }
 0x1b1   : > { %v1199_v55 = vmul.f32 -1.442695, %v730_v54  ;;  %v732_v56 = vpop.f32.mrb[2].mxu0  ;;  %v771_v59 = vpop.f32.mrb[1].mxu1 }
 0x1b2   : > { %1459 = vpow2.f32 %v1198_v53  ;;  %v733_v57 = vpop.f32.mrb[3].mxu0  ;;  %v773_v60 = vpop.f32.mrb[2].mxu1 }
 0x1b3   : > { %1461 = vpow2.f32 %v1199_v55  ;;  %v774_v62 = vpop.f32.mrb[3].mxu1 }
 0x1bc   : > { %v1460_v61 = vpop.eup %1459 }
 0x1bd   : > { %v1462_v63 = vpop.eup %1461  ;;  %v782_v0 = vadd.f32 1.0, %v1460_v61 }
 0x1be   : > { %v783_v1 = vadd.f32 1.0, %v1462_v63 }
 0x1bf   : > { %1463 = vrcp.f32 %v782_v0 }
 0x1c0   : > { %1465 = vrcp.f32 %v783_v1 }
 0x1c9   : > { %v1464_v2 = vpop.eup %1463 }
 0x1ca   : > { %v1466_v3 = vpop.eup %1465  ;;  %v788_v4 = vmul.f32 %v1464_v2, %v728_v52 }
 0x1cb   : > { %v789_v5 = vmul.f32 %v1466_v3, %v730_v54 }
 0x1cc   : > { %v790_v7 = vmul.f32 %v788_v4, %v769_v58 }
 0x1cd   : > { %v791_v8 = vmul.f32 %v789_v5, %v771_v59 }
 0x1ce   : > { %v798_v9 = vmul.f32 %v796_v6, %v790_v7 }
 0x1cf   : > { %v799_v10 = vmul.f32 %v796_v6, %v791_v8 }
 0x1d0   : > { %v800_v12 = vpack.c.bf16 %v798_v9, %v798_v9 }
 0x1d1   : > { %v801_v11 = vpack.c.bf16 %v799_v10, %v799_v10 }
 0x1d3   : > { %962 = vmatprep.mubr.bf16.mxu0 %v801_v11 }
 0x1d4   : > { %963 = vmatmul.mubr.bf16.vlgmr.msra.gmra.mrb[4].mxu0 %v800_v12 }
 0x2a7   : > { %v1241_v13 = vpop.f32.mrb[4].mxu0 }
 0x2a8   : > { %v1242_v14 = vpop.f32.mrb[5].mxu0 }
 0x2a9   : > { %v1243_v16 = vadd.f32 %v1242_v14, %v1241_v13  ;;  %v1244_v17 = vpop.f32.mrb[6].mxu0 }
 0x2aa   : > { %v1245_v18 = vpop.f32.mrb[7].mxu0 }
 0x2ab   : > { %v971_v19 = vadd.f32 %v1243_v16, %v970_v15 }
 0x2ad   : > { %972 = vst [vmem:[#allocation2] sm:$0xff] %v971_v19 }
 0x2ae PF: > { %p973_p9 = scmp.eq.s32.totalorder %s1687_s14, 3 }
 0x2b0   : > { %977 = sbr.rel (!%p973_p9) target bundleno = 695 (0x2b7), region = 56 }
 0x2b4   : > { %v978_v20 = vld [vmem:[#allocation2] sm:$0xff] (%p973_p9) }
 0x2b5   : > { %979 = vst [vmem:[%s430_s22] sm:$0xff] (%p973_p9), %v978_v20 }
 0x2b7 PF: > { %s1218_s21 = sshll.u32 %s1691_s15, 7  ;;  %s2249_s16 = sld [smem:[#allocation31_spill]] }
 0x2b8   : > { %s994_s20 = sshll.u32 %s430_s22, 4  ;;  %s981_s14 = scalar_lea.sflag [#allocation8], %s428_s8  ;;  %s995_s20 = int_to_ptr.vmem [resolvable:$true] %s994_s20 }
 0x2b9   : > { %s1551_s25 = scalar_lea.vmem %s995_s20, 128  ;;  %p2251_p1 = scmp.ne.s32.totalorder %s2234_s6, 0 }
 0x2ba   : > { %p1552_p0 = scmp.ne.s32.totalorder %s995_s20, %s1551_s25  ;;  %s1715_s7 = smov [#allocation11]  }
 0x2bb   : > { %s1555_s26 = sshll.u32 %s1715_s7, 4  ;;  %s1556_s26 = int_to_ptr.vmem [resolvable:$false] %s1555_s26 }
 0x2bc   : > { %p1553_p2 = pnand %p1552_p0, %p2251_p1  ;;  %s1557_s24 = scalar_lea.vmem %s1556_s26, 256 }
 0x2bd   : > { %s2250_s23 = smov %s2249_s16  ;;  %s2123_s17 = scalar_lea.hbm %s2249_s16, %s1218_s21 }
 0x2be   : > { %p1554_p5 = pneg %p1553_p2  ;;  %p1558_p3 = scmp.lt.s32.totalorder %s995_s20, %s1556_s26 }
 0x2bf   : > { %p1559_p10 = scmp.lt.s32.totalorder %s1557_s24, %s1551_s25 }
 0x2c1   : > { %p1560_p11 = por %p1559_p10, %p1558_p3 }
 0x2c3   : > { %p1561_p4 = pnand %p1560_p11, %p1554_p5 }
 0x2c5   : > { %1564 = shalt.err (!%p1561_p4)
}
 0x2c6   : > { %s1565_s15 = scalar_lea.hbm %s2123_s17, 128  ;;  %s1569_s1 = scalar_lea.hbm %s2250_s23, 256 }
 0x2c7   : > { %p1566_p13 = scmp.ne.s32.totalorder %s2123_s17, %s1565_s15  ;;  %p1570_p12 = scmp.lt.u32.totalorder %s2123_s17, %s2250_s23 }
 0x2c8   : > { %p1571_p7 = scmp.lt.u32.totalorder %s1569_s1, %s1565_s15  ;;  %p1573_p0 = scmp.lt.u32.totalorder %s1565_s15, %s2123_s17 }
 0x2c9   : > { %p1567_p8 = pnand %p1566_p13, %p2251_p1 }
 0x2ca   : > { %p1572_p9 = por %p1571_p7, %p1570_p12 }
 0x2cb   : > { %p1568_p6 = pneg %p1567_p8 }
 0x2cc   : > { %p1574_p2 = por %p1573_p0, %p1572_p9 }
 0x2ce   : > { %p1575_p5 = pnand %p1574_p2, %p1568_p6 }
 0x2d0   : > { %1578 = shalt.err (!%p1575_p5)
}
 0x2d1   : > { %1255 = dma.vmem_to_hbm [thread:$0]  (%p2251_p1), %s995_s20, 128, %s2123_s17, %s981_s14  }
 0x2d2 PF: > { %s2252_s0 = sld [smem:[#allocation20_spill]]  ;;  %s2253_s22 = sld [smem:[#allocation28_spill]] }
 0x2d3   : > { %p1273_p3 = scmp.ge.s32.totalorder %s1703_s18, 2 }
 0x2d8   : > { %s1006_s29 = sand.u32 1, %s2252_s0   ;;  %p2254_p10 = scmp.ne.s32.totalorder %s2253_s22, 0 }
 0x2d9   : > { %s1007_s21 = scalar_lea.sflag [#allocation8], %s1006_s29 }
 0x2da   : > { %p1269_p11 = pnand %p1273_p3, %p2254_p10 }
 0x2dc   : > { %1646 = dma.done.wait (!%p1269_p11), %s1007_s21, 128  }
 0x2dd   : > { %1648 = vsyncadd (!%p1269_p11), %s1007_s21, 4294967168  ;;  %s35_s18 = sadd.s32 1, %s1703_s18   ;;  %s2256_s6 = sld [smem:[#allocation21_spill]] }
 0x2de   : > { %p2151_p4 = scmp.ge.s32.totalorder %s35_s18, 10   ;;  %s2257_s7 = sld [smem:[#allocation27_spill]] }
 0x2df   : > { %s2258_s16 = sld [smem:[#allocation22_spill]]  ;;  %s2259_s13 = sld [smem:[#allocation29_spill]] }
 0x2e0   : > { %s2260_s14 = sld [smem:[#allocation23_spill]]  ;;  %s2261_s15 = sld [smem:[#allocation24_spill]] }
 0x2e1   : > { %s2262_s17 = sld [smem:[#allocation25_spill]]  ;;  %s2263_s20 = sld [smem:[#allocation26_spill]] }
 0x2e2   : > { %s2264_s1 = smov %s1655_s30  ;;  %s2266_s8 = smov %s1667_s9 }
 0x2e3   : > { %s2265_s30 = smov %s2256_s6  ;;  %s2267_s9 = smov %s1671_s10 }
 0x2e4   : > { %s2268_s10 = smov %s1980_s4  ;;  %s2269_s11 = smov %s1679_s12 }
 0x2e5   : > { %s2270_s12 = smov %s2258_s16  ;;  %34 = sbr.rel (!%p2151_p4) target bundleno = 38 (0x26), region = 112 }
 0x2e7   : > { %s2271_s16 = smov %s2262_s17  ;;  %s2272_s17 = smov %s2263_s20 }
 0x2ec   :  { %1012 = vsyncpa [#allocation7], 1 }
 0x2ed   :  { %1014 = vsyncpa [#allocation7 + $0x1], 1 }
 0x2ee   :  { %1015 = vsyncpa [#allocation10], 1 }
 0x2ef   :  { %1017 = vsyncpa [#allocation10 + $0x1], 1 }
 0x2f0   :  { %1018 = vsyncpa [#allocation8], 1 }
 0x2f1   :  { %1020 = vsyncpa [#allocation8 + $0x1], 1 }

</bundles_post_ra>
